<compile_context>
chip_gen: v6e
topology: v6e:2x2x1
jax: 0.10.0
libtpu: 0.0.40
codegen_flags: <defaults>
</compile_context>

<pallas_src>
import functools

import jax
import jax.numpy as jnp
import numpy as np
from jax.experimental import pallas as pl
from jax.experimental.pallas import tpu as pltpu


_ROWS = 8           # sublane rows of the flat view: one full vreg sublane group
_COL_ALIGN = 640    # lcm(128 lanes, 5 features): the feature pattern is then
                    # identical in every block and in every sublane row


def _tnl_kernel(mask_ref, o1_ref, o2_ref, o3_ref, l1_ref, l2_ref, l3_ref,
                out_ref, acc_ref, *, c_total, block_cols):
    """Accumulate sum(d1err)+sum(d2err)+sum(d3err)+sum(area_err) per core."""
    i = pl.program_id(0)       # core split ("parallel")
    j = pl.program_id(1)       # column blocks ("arbitrary", reduction axis)
    nj = pl.num_programs(1)

    @pl.when(j == 0)
    def _init():
        acc_ref[...] = jnp.zeros_like(acc_ref)

    o1 = o1_ref[...].astype(jnp.float32)
    o2 = o2_ref[...].astype(jnp.float32)
    o3 = o3_ref[...].astype(jnp.float32)
    l1 = l1_ref[...].astype(jnp.float32)
    l2 = l2_ref[...].astype(jnp.float32)
    l3 = l3_ref[...].astype(jnp.float32)

    # Normal-vector error (feature cols 0:3) fused across the three tensors,
    # and the area error (feature cols 3:5, labels taken from d1).
    nerr = jnp.abs(l1 - o1) + jnp.abs(l2 - o2) + jnp.abs(l3 - o3)
    area = (o1 + o2 + o3) * jnp.float32(1.0 / 3.0)
    aerr = jnp.abs(l1 - area)

    is_normal = mask_ref[...] > jnp.float32(0.5)            # (1, block_cols)
    err = jnp.where(is_normal, nerr, aerr)                   # (8, block_cols)

    # Zero out logical columns past the real data: the partial tail block and
    # (on the core whose logical range over-runs) the clamped duplicate block.
    col0 = (i * nj + j) * block_cols
    col = col0 + jax.lax.broadcasted_iota(jnp.int32, err.shape, dimension=1)
    err = jnp.where(col < c_total, err, jnp.float32(0.0))

    acc_ref[...] = acc_ref[...] + err                        # pure VPU add

    @pl.when(j == nj - 1)
    def _finalize():
        total = jnp.sum(acc_ref[...])                        # one reduce / core
        out_ref[...] = jnp.full((1, _ROWS, 128), total, dtype=jnp.float32)


def tensor_normal_loss(outd1, outd2, outd3, label, mtloss,
                       d1annot, d2annot, d3annot, *,
                       block_cols=32640, num_cores=2):
    """JAX/Pallas equivalent of TensorNormalLoss.forward -> (loss, mtloss)."""
    del label  # reshaped-but-unused in the PyTorch forward

    n = outd1.shape[0]

    # Free contiguous flat views; all six share the same flat index n*5 + c.
    flats = [jnp.reshape(a, (-1,)) for a in
             (outd1, outd2, outd3, d1annot, d2annot, d3annot)]

    n8 = ((n + _ROWS - 1) // _ROWS) * _ROWS
    if n8 != n:
        # TODO(synk): this fallback copies the inputs once (zeros contribute 0
        # to every |.| term); keep N % 8 == 0 upstream for the zero-copy path.
        pad = (n8 - n) * 5
        flats = [jnp.pad(f, (0, pad)) for f in flats]
    c_total = (n8 * 5) // _ROWS                     # multiple of 5 by design
    mats = [jnp.reshape(f, (_ROWS, c_total)) for f in flats]

    # Column-block size: multiple of lcm(128, 5); clamp so tiny inputs use a
    # single block.  (On v7x, block_cols=65280 is marginally better.)
    bc = max(_COL_ALIGN, (int(block_cols) // _COL_ALIGN) * _COL_ALIGN)
    bc = min(bc, pl.cdiv(c_total, _COL_ALIGN) * _COL_ALIGN)
    num_blocks = pl.cdiv(c_total, bc)
    per_core = pl.cdiv(num_blocks, num_cores)

    # 1 = normal column (features 0:3), 0 = area column (features 3:5).
    # Periodic with period 5, so one small constant serves every block/row.
    is_normal = np.tile((np.arange(5) < 3).astype(np.float32), bc // 5)
    is_normal = jnp.asarray(is_normal.reshape(1, bc))

    def data_map(i, j):
        # Clamp so a core whose logical range over-runs re-reads the last real
        # block; its contribution is zeroed by the in-kernel column mask.
        return (0, jnp.minimum(i * per_core + j, num_blocks - 1))

    data_spec = pl.BlockSpec((_ROWS, bc), data_map)

    partials = pl.pallas_call(
        functools.partial(_tnl_kernel, c_total=c_total, block_cols=bc),
        out_shape=jax.ShapeDtypeStruct((num_cores, _ROWS, 128), jnp.float32),
        grid_spec=pltpu.PrefetchScalarGridSpec(
            num_scalar_prefetch=0,
            grid=(num_cores, per_core),
            in_specs=[pl.BlockSpec((1, bc), lambda i, j: (0, 0))]   # mask
                     + [data_spec] * 6,                              # o1..l3
            out_specs=pl.BlockSpec((1, _ROWS, 128), lambda i, j: (i, 0, 0)),
            scratch_shapes=[pltpu.VMEM((_ROWS, bc), jnp.float32)],
        ),
        compiler_params=pltpu.CompilerParams(
            dimension_semantics=("parallel", "arbitrary"),
            vmem_limit_bytes=32 * 1024 * 1024,
        ),
    )(is_normal, *mats)

    total = jnp.sum(partials[:, 0, 0])              # one partial per core
    err = total / jnp.float32(n * 11)
    loss = err + jnp.float32(0.001) * jnp.asarray(mtloss, dtype=jnp.float32)
    return loss, mtloss


def _reference(outd1, outd2, outd3, label, mtloss, d1annot, d2annot, d3annot):
    d1label = jnp.reshape(d1annot, (-1, 5))
    d2label = jnp.reshape(d2annot, (-1, 5))
    d3label = jnp.reshape(d3annot, (-1, 5))
    d1err = jnp.abs(d1label[:, 0:3] - outd1[:, 0:3])
    d2err = jnp.abs(d2label[:, 0:3] - outd2[:, 0:3])
    d3err = jnp.abs(d3label[:, 0:3] - outd3[:, 0:3])
    area = (outd1[:, 3:] + outd2[:, 3:] + outd3[:, 3:]) / 3.0
    area_err = jnp.abs(d1label[:, 3:] - area)
    err = jnp.mean(jnp.concatenate((d1err, d2err, d3err, area_err), axis=1))
    return err + 0.001 * mtloss, mtloss


if __name__ == "__main__":
    root = jax.random.PRNGKey(0)

    def make_inputs(key, batch, seq):
        ks = jax.random.split(key, 8)
        n = batch * seq
        outd1 = jax.random.normal(ks[0], (n, 5), dtype=jnp.float32)
        outd2 = jax.random.normal(ks[1], (n, 5), dtype=jnp.float32)
        outd3 = jax.random.normal(ks[2], (n, 5), dtype=jnp.float32)
        label = jax.random.normal(ks[3], (batch, seq, 11), dtype=jnp.float32)
        mtloss = jax.random.normal(ks[4], (), dtype=jnp.float32)
        d1annot = jax.random.normal(ks[5], (batch, seq, 5), dtype=jnp.float32)
        d2annot = jax.random.normal(ks[6], (batch, seq, 5), dtype=jnp.float32)
        d3annot = jax.random.normal(ks[7], (batch, seq, 5), dtype=jnp.float32)
        return (outd1, outd2, outd3, label, mtloss, d1annot, d2annot, d3annot)

    tnl = jax.jit(tensor_normal_loss,
                  static_argnames=("block_cols", "num_cores"))

    cases = [
        # N=8: zero-copy path, single heavily-masked block, clamped core-1 work.
        dict(batch=2, seq=4),
        # N=1040 with block_cols=640: two blocks (one ragged), both cores busy.
        dict(batch=2, seq=520, block_cols=640),
        # N=10: N % 8 != 0 -> zero-pad fallback path.
        dict(batch=2, seq=5),
    ]
    keys = jax.random.split(root, len(cases))
    for key, case in zip(keys, cases):
        kwargs = {k: v for k, v in case.items() if k == "block_cols"}
        args = make_inputs(key, case["batch"], case["seq"])
        loss, mt_out = tnl(*args, **kwargs)
        jax.block_until_ready((loss, mt_out))
        ref_loss, ref_mt = _reference(*args)
        assert jnp.allclose(loss, ref_loss, rtol=1e-5, atol=1e-5), \
            (case, loss, ref_loss)
        assert jnp.allclose(mt_out, ref_mt, rtol=1e-6, atol=1e-6), \
            (case, mt_out, ref_mt)

    print("KERNEL_OK")
</pallas_src>

<mosaic_0001>
module attributes {stable_mosaic.version = 11 : i64} {
  func.func @_tnl_kernel(%arg0: i32, %arg1: i32, %arg2: memref<1x640xf32, #tpu.memory_space<vmem>>, %arg3: memref<8x640xf32, #tpu.memory_space<vmem>>, %arg4: memref<8x640xf32, #tpu.memory_space<vmem>>, %arg5: memref<8x640xf32, #tpu.memory_space<vmem>>, %arg6: memref<8x640xf32, #tpu.memory_space<vmem>>, %arg7: memref<8x640xf32, #tpu.memory_space<vmem>>, %arg8: memref<8x640xf32, #tpu.memory_space<vmem>>, %arg9: memref<1x8x128xf32, #tpu.memory_space<vmem>>, %arg10: memref<8x640xf32, #tpu.memory_space<vmem>>) attributes {dimension_semantics = [#tpu.dimension_semantics<parallel>, #tpu.dimension_semantics<arbitrary>], iteration_bounds = array<i64: 2, 1>, scalar_prefetch = 0 : i64, scratch_operands = 1 : i64, tpu.core_type = #tpu.core_type<tc>, window_params = [{pipeline_mode = #tpu.pipeline_mode<synchronous>, transform_indices = @transform_0, window_bounds = array<i64: 1, 640>}, {transform_indices = @transform_1, window_bounds = array<i64: 8, 640>}, {transform_indices = @transform_2, window_bounds = array<i64: 8, 640>}, {transform_indices = @transform_3, window_bounds = array<i64: 8, 640>}, {transform_indices = @transform_4, window_bounds = array<i64: 8, 640>}, {transform_indices = @transform_5, window_bounds = array<i64: 8, 640>}, {transform_indices = @transform_6, window_bounds = array<i64: 8, 640>}, {transform_indices = @transform_7, window_bounds = array<i64: 1, 8, 128>}]} {
    %c0_i32 = arith.constant 0 : i32
    %0 = arith.cmpi eq, %arg1, %c0_i32 : i32
    %1 = arith.extui %0 : i1 to i32
    %c0_i32_0 = arith.constant 0 : i32
    %2 = arith.cmpi ne, %1, %c0_i32_0 : i32
    scf.if %2 {
      %cst_22 = arith.constant 0.000000e+00 : f32
      %45 = vector.broadcast %cst_22 : f32 to vector<8x640xf32>
      %c0_23 = arith.constant 0 : index
      %c0_24 = arith.constant 0 : index
      %46 = vector.load %arg10[%c0_23, %c0_24] : memref<8x640xf32, #tpu.memory_space<vmem>>, vector<8x640xf32>
      tpu.vector_store %arg10[%c0_23, %c0_24], %45 {strides = array<i32>} : memref<8x640xf32, #tpu.memory_space<vmem>>, vector<8x640xf32>,
    } else {
    }
    %c0 = arith.constant 0 : index
    %c0_1 = arith.constant 0 : index
    %3 = vector.load %arg3[%c0, %c0_1] : memref<8x640xf32, #tpu.memory_space<vmem>>, vector<8x640xf32>
    %c0_2 = arith.constant 0 : index
    %c0_3 = arith.constant 0 : index
    %4 = vector.load %arg4[%c0_2, %c0_3] : memref<8x640xf32, #tpu.memory_space<vmem>>, vector<8x640xf32>
    %c0_4 = arith.constant 0 : index
    %c0_5 = arith.constant 0 : index
    %5 = vector.load %arg5[%c0_4, %c0_5] : memref<8x640xf32, #tpu.memory_space<vmem>>, vector<8x640xf32>
    %c0_6 = arith.constant 0 : index
    %c0_7 = arith.constant 0 : index
    %6 = vector.load %arg6[%c0_6, %c0_7] : memref<8x640xf32, #tpu.memory_space<vmem>>, vector<8x640xf32>
    %c0_8 = arith.constant 0 : index
    %c0_9 = arith.constant 0 : index
    %7 = vector.load %arg7[%c0_8, %c0_9] : memref<8x640xf32, #tpu.memory_space<vmem>>, vector<8x640xf32>
    %c0_10 = arith.constant 0 : index
    %c0_11 = arith.constant 0 : index
    %8 = vector.load %arg8[%c0_10, %c0_11] : memref<8x640xf32, #tpu.memory_space<vmem>>, vector<8x640xf32>
    %9 = arith.subf %6, %3 : vector<8x640xf32>
    %10 = math.absf %9 : vector<8x640xf32>
    %11 = arith.subf %7, %4 : vector<8x640xf32>
    %12 = math.absf %11 : vector<8x640xf32>
    %13 = arith.addf %10, %12 : vector<8x640xf32>
    %14 = arith.subf %8, %5 : vector<8x640xf32>
    %15 = math.absf %14 : vector<8x640xf32>
    %16 = arith.addf %13, %15 : vector<8x640xf32>
    %17 = arith.addf %3, %4 : vector<8x640xf32>
    %18 = arith.addf %17, %5 : vector<8x640xf32>
    %cst = arith.constant 0.333333343 : f32
    %19 = vector.broadcast %cst : f32 to vector<8x640xf32>
    %20 = arith.mulf %18, %19 : vector<8x640xf32>
    %21 = arith.subf %6, %20 : vector<8x640xf32>
    %22 = math.absf %21 : vector<8x640xf32>
    %c0_12 = arith.constant 0 : index
    %c0_13 = arith.constant 0 : index
    %23 = vector.load %arg2[%c0_12, %c0_13] : memref<1x640xf32, #tpu.memory_space<vmem>>, vector<1x640xf32>
    %cst_14 = arith.constant 5.000000e-01 : f32
    %24 = vector.broadcast %cst_14 : f32 to vector<1x640xf32>
    %25 = arith.cmpf ogt, %23, %24 : vector<1x640xf32>
    %26 = vector.shape_cast %25 : vector<1x640xi1> to vector<1x640xi1>
    %27 = vector.broadcast %26 : vector<1x640xi1> to vector<8x640xi1>
    %28 = arith.select %27, %16, %22 : vector<8x640xi1>, vector<8x640xf32>
    %c1_i32 = arith.constant 1 : i32
    %29 = arith.muli %arg0, %c1_i32 : i32
    %30 = arith.addi %29, %arg1 : i32
    %c640_i32 = arith.constant 640 : i32
    %31 = arith.muli %30, %c640_i32 : i32
    %32 = tpu.iota {dimensions = array<i32: 1>} : vector<8x640xi32>
    %33 = vector.broadcast %31 : i32 to vector<8x640xi32>
    %34 = arith.addi %33, %32 : vector<8x640xi32>
    %c5_i32 = arith.constant 5 : i32
    %35 = vector.broadcast %c5_i32 : i32 to vector<8x640xi32>
    %36 = arith.cmpi slt, %34, %35 : vector<8x640xi32>
    %cst_15 = arith.constant 0.000000e+00 : f32
    %37 = vector.broadcast %cst_15 : f32 to vector<8x640xf32>
    %38 = arith.select %36, %28, %37 : vector<8x640xi1>, vector<8x640xf32>
    %c0_16 = arith.constant 0 : index
    %c0_17 = arith.constant 0 : index
    %39 = vector.load %arg10[%c0_16, %c0_17] : memref<8x640xf32, #tpu.memory_space<vmem>>, vector<8x640xf32>
    %40 = arith.addf %39, %38 : vector<8x640xf32>
    %c0_18 = arith.constant 0 : index
    %c0_19 = arith.constant 0 : index
    %41 = vector.load %arg10[%c0_18, %c0_19] : memref<8x640xf32, #tpu.memory_space<vmem>>, vector<8x640xf32>
    tpu.vector_store %arg10[%c0_18, %c0_19], %40 {strides = array<i32>} : memref<8x640xf32, #tpu.memory_space<vmem>>, vector<8x640xf32>,
    %c0_i32_20 = arith.constant 0 : i32
    %42 = arith.cmpi eq, %arg1, %c0_i32_20 : i32
    %43 = arith.extui %42 : i1 to i32
    %c0_i32_21 = arith.constant 0 : i32
    %44 = arith.cmpi ne, %43, %c0_i32_21 : i32
    scf.if %44 {
      %c0_22 = arith.constant 0 : index
      %c0_23 = arith.constant 0 : index
      %45 = vector.load %arg10[%c0_22, %c0_23] : memref<8x640xf32, #tpu.memory_space<vmem>>, vector<8x640xf32>
      %46 = vector.shape_cast %45 : vector<8x640xf32> to vector<1x8x640xf32>
      %cst_24 = arith.constant dense<0.000000e+00> : vector<1xf32>
      %47 = vector.multi_reduction <add>, %46, %cst_24 [1, 2] : vector<1x8x640xf32> to vector<1xf32>
      %48 = vector.shape_cast %47 : vector<1xf32> to vector<1x1x1xf32>
      %49 = vector.extract %48[0, 0, 0] : f32 from vector<1x1x1xf32>
      %50 = vector.broadcast %49 : f32 to vector<1x8x128xf32>
      %c0_25 = arith.constant 0 : index
      %c0_26 = arith.constant 0 : index
      %c0_27 = arith.constant 0 : index
      %51 = vector.load %arg9[%c0_25, %c0_26, %c0_27] : memref<1x8x128xf32, #tpu.memory_space<vmem>>, vector<1x8x128xf32>
      tpu.vector_store %arg9[%c0_25, %c0_26, %c0_27], %50 {strides = array<i32>} : memref<1x8x128xf32, #tpu.memory_space<vmem>>, vector<1x8x128xf32>,
    } else {
    }
    return
  }
  func.func @transform_0(%arg0: i32, %arg1: i32) -> (i32, i32) {
    %c0_i32 = arith.constant 0 : i32
    %c0_i32_0 = arith.constant 0 : i32
    %c0_i32_1 = arith.constant 0 : i32
    return %c0_i32, %c0_i32_0 : i32, i32
  }
  func.func @transform_1(%arg0: i32, %arg1: i32) -> (i32, i32) {
    %c1_i32 = arith.constant 1 : i32
    %0 = arith.muli %arg0, %c1_i32 : i32
    %1 = arith.addi %0, %arg1 : i32
    %c0_i32 = arith.constant 0 : i32
    %2 = arith.minsi %1, %c0_i32 : i32
    %c0_i32_0 = arith.constant 0 : i32
    %c0_i32_1 = arith.constant 0 : i32
    return %c0_i32_0, %2 : i32, i32
  }
  func.func @transform_2(%arg0: i32, %arg1: i32) -> (i32, i32) {
    %c1_i32 = arith.constant 1 : i32
    %0 = arith.muli %arg0, %c1_i32 : i32
    %1 = arith.addi %0, %arg1 : i32
    %c0_i32 = arith.constant 0 : i32
    %2 = arith.minsi %1, %c0_i32 : i32
    %c0_i32_0 = arith.constant 0 : i32
    %c0_i32_1 = arith.constant 0 : i32
    return %c0_i32_0, %2 : i32, i32
  }
  func.func @transform_3(%arg0: i32, %arg1: i32) -> (i32, i32) {
    %c1_i32 = arith.constant 1 : i32
    %0 = arith.muli %arg0, %c1_i32 : i32
    %1 = arith.addi %0, %arg1 : i32
    %c0_i32 = arith.constant 0 : i32
    %2 = arith.minsi %1, %c0_i32 : i32
    %c0_i32_0 = arith.constant 0 : i32
    %c0_i32_1 = arith.constant 0 : i32
    return %c0_i32_0, %2 : i32, i32
  }
  func.func @transform_4(%arg0: i32, %arg1: i32) -> (i32, i32) {
    %c1_i32 = arith.constant 1 : i32
    %0 = arith.muli %arg0, %c1_i32 : i32
    %1 = arith.addi %0, %arg1 : i32
    %c0_i32 = arith.constant 0 : i32
    %2 = arith.minsi %1, %c0_i32 : i32
    %c0_i32_0 = arith.constant 0 : i32
    %c0_i32_1 = arith.constant 0 : i32
    return %c0_i32_0, %2 : i32, i32
  }
  func.func @transform_5(%arg0: i32, %arg1: i32) -> (i32, i32) {
    %c1_i32 = arith.constant 1 : i32
    %0 = arith.muli %arg0, %c1_i32 : i32
    %1 = arith.addi %0, %arg1 : i32
    %c0_i32 = arith.constant 0 : i32
    %2 = arith.minsi %1, %c0_i32 : i32
    %c0_i32_0 = arith.constant 0 : i32
    %c0_i32_1 = arith.constant 0 : i32
    return %c0_i32_0, %2 : i32, i32
  }
  func.func @transform_6(%arg0: i32, %arg1: i32) -> (i32, i32) {
    %c1_i32 = arith.constant 1 : i32
    %0 = arith.muli %arg0, %c1_i32 : i32
    %1 = arith.addi %0, %arg1 : i32
    %c0_i32 = arith.constant 0 : i32
    %2 = arith.minsi %1, %c0_i32 : i32
    %c0_i32_0 = arith.constant 0 : i32
    %c0_i32_1 = arith.constant 0 : i32
    return %c0_i32_0, %2 : i32, i32
  }
  func.func @transform_7(%arg0: i32, %arg1: i32) -> (i32, i32, i32) {
    %c0_i32 = arith.constant 0 : i32
    %c0_i32_0 = arith.constant 0 : i32
    %c0_i32_1 = arith.constant 0 : i32
    return %arg0, %c0_i32, %c0_i32_0 : i32, i32, i32
  }
}

</mosaic_0001>

<bundles_post_ra>
// kernel: tensor_normal_loss.1
= control target key start
LH: loop header
LB: loop body
LE: loop exit
PB: predicated region body
PF: predicated region fallthrough
CT: control target
= control target key end

     0   :  { %12 = vsyncpa [#allocation4], 0  ;;  %s1509_s0 = inlined_call_operand.vmem [shape: f32[1,640], index: 0, kind: input, shape index: {}]   ;;  %s1510_s1 = inlined_call_operand.vmem [shape: f32[8,5], index: 1, kind: input, shape index: {}]   ;;  %s1511_s2 = inlined_call_operand.vmem [shape: f32[8,5], index: 2, kind: input, shape index: {}]   ;;  %s1512_s3 = inlined_call_operand.hbm [shape: f32[8,5], index: 3, kind: input, shape index: {}]   ;;  %s1513_s4 = inlined_call_operand.hbm [shape: f32[8,5], index: 4, kind: input, shape index: {}]   ;;  %s1514_s5 = inlined_call_operand.hbm [shape: f32[8,5], index: 5, kind: input, shape index: {}]   ;;  %s1515_s6 = inlined_call_operand.hbm [shape: f32[8,5], index: 6, kind: input, shape index: {}]   ;;  %s1516_s7 = inlined_call_operand.vmem [shape: f32[2,8,128], index: 7, kind: output, shape index: {}]  }
   0x1   :  { %14 = vsyncpa [#allocation4 + $0x1], 0 }
   0x2   :  { %15 = vsyncpa [#allocation6], 0 }
   0x3   :  { %17 = vsyncpa [#allocation6 + $0x1], 0 }
   0x4   :  { %18 = vsyncpa [#allocation9], 0 }
   0x5   :  { %20 = vsyncpa [#allocation9 + $0x1], 0  ;;  %s1270_s24 = smov 0   ;;  %s1272_s25 = smov 0  }
   0x6   :  { %s1274_s26 = smov 0   ;;  %s1276_s27 = smov 0  }
   0x7   :  { %s1278_s28 = smov 0  }
   0x8 LB: > { %s38_s29 = sadd.s32 1, %s1219_s27  ;;  %s962_s30 = sadd.s32 4294967295, %s1223_s28   ;;  %s1223_s28 = sphi %s1278_s28, %s26_s28   ;;  %s1219_s27 = sphi %s1276_s27, %s1522_s27   ;;  %s1215_s26 = sphi %s1274_s26, %s1521_s26   ;;  %s1211_s25 = sphi %s1272_s25, %s1499_s25   ;;  %s1207_s24 = sphi %s1270_s24, %s1520_s24  }
   0x9   : > { %p40_p0 = scmp.ge.s32.totalorder %s38_s29, 2  ;;  %p1204_p1 = scmp.ne.s32.totalorder %s1211_s25, 0 }
   0xa   : > { %p144_p2 = scmp.eq.s32.totalorder %s1223_s28, 0  ;;  %p149_p3 = scmp.ne.s32.totalorder %s1211_s25, %s1207_s24 }
   0xb   : > { %s1524_s29 = smov (%p40_p0, %s38_s29), 0  ;;  %p150_p4 = scmp.eq.s32.totalorder %s962_s30, 0 }
   0xc   : > { %p1302_p5 = por %p1204_p1, %p144_p2  ;;  %p965_p7 = scmp.ge.s32.totalorder %s1223_s28, 2 }
   0xd   : > { %p1306_p6 = por %p150_p4, %p149_p3 }
   0xe   : > { %294 = sbr.rel (%p965_p7) target bundleno = 107 (0x6b), region = 20 }
  0x13   : > { %335 = sbr.rel (!%p1302_p5) target bundleno = 41 (0x29), region = 32 }
  0x18   : > { %349 = vsyncadd [#allocation4], 512  ;;  %s1225_s10 = smov [#allocation3]   ;;  %s1056_s14 = scalar_lea.hbm %s1512_s3, 128 }
  0x19   : > { %s355_s11 = sshll.u32 %s1225_s10, 4  ;;  %p1057_p8 = scmp.ne.s32.totalorder %s1512_s3, %s1056_s14  ;;  %s356_s11 = int_to_ptr.vmem [resolvable:$true] %s355_s11 }
  0x1a   : > { %p1062_p9 = scmp.lt.s32.totalorder %s1056_s14, %s1056_s14 }
  0x1c   : > { %p1064_p10 = pnand %p1062_p9, %p1057_p8 }
  0x1e   : > { %1067 = shalt.err (!%p1064_p10)
}
  0x1f   : > { %s1068_s17 = scalar_lea.vmem %s356_s11, 128  ;;  %s1074_s18 = scalar_lea.vmem %s356_s11, 1280 }
  0x20   : > { %p1069_p11 = scmp.ne.s32.totalorder %s356_s11, %s1068_s17  ;;  %p1075_p12 = scmp.lt.s32.totalorder %s356_s11, %s356_s11 }
  0x21   : > { %p1076_p13 = scmp.lt.s32.totalorder %s1074_s18, %s1068_s17 }
  0x23   : > { %p1077_p0 = por %p1076_p13, %p1075_p12 }
  0x25   : > { %p1078_p1 = pnand %p1077_p0, %p1069_p11 }
  0x27   : > { %1081 = shalt.err (!%p1078_p1)
}
  0x28   : > { %358 = dma.hbm_to_vmem [thread:$0]  %s1512_s3, 128, %s356_s11, [#allocation4]  }
  0x29 PF: > { %361 = sbr.rel (!%p1302_p5) target bundleno = 63 (0x3f), region = 36  ;;  %s362_s21 = sand.u32 (%p1302_p5), 1, %s1223_s28  }
  0x2a   : > { %s363_s22 = scalar_lea.sflag (%p1302_p5), [#allocation6], %s362_s21 }
  0x2e   : > { %375 = vsyncadd %s363_s22, 512  ;;  %s1226_s23 = smov [#allocation5]   ;;  %s1082_s13 = scalar_lea.hbm %s1513_s4, 128 }
  0x2f   : > { %s381_s24 = sshll.u32 %s1226_s23, 4  ;;  %p1083_p2 = scmp.ne.s32.totalorder %s1513_s4, %s1082_s13  ;;  %s382_s24 = int_to_ptr.vmem [resolvable:$true] %s381_s24 }
  0x30   : > { %p1088_p3 = scmp.lt.s32.totalorder %s1082_s13, %s1082_s13 }
  0x32   : > { %p1090_p4 = pnand %p1088_p3, %p1083_p2 }
  0x34   : > { %1093 = shalt.err (!%p1090_p4)
}
  0x35   : > { %s1094_s11 = scalar_lea.vmem %s382_s24, 128  ;;  %s1100_s16 = scalar_lea.vmem %s382_s24, 1280 }
  0x36   : > { %p1095_p7 = scmp.ne.s32.totalorder %s382_s24, %s1094_s11  ;;  %p1101_p8 = scmp.lt.s32.totalorder %s382_s24, %s382_s24 }
  0x37   : > { %p1102_p9 = scmp.lt.s32.totalorder %s1100_s16, %s1094_s11 }
  0x39   : > { %p1103_p10 = por %p1102_p9, %p1101_p8 }
  0x3b   : > { %p1104_p11 = pnand %p1103_p10, %p1095_p7 }
  0x3d   : > { %1107 = shalt.err (!%p1104_p11)
}
  0x3e   : > { %384 = dma.hbm_to_vmem [thread:$0]  %s1513_s4, 128, %s382_s24, %s363_s22  }
  0x3f PF: > { %387 = sbr.rel (!%p1302_p5) target bundleno = 85 (0x55), region = 40  ;;  %s388_s19 = sand.u32 (%p1302_p5), 1, %s1223_s28  }
  0x40   : > { %s389_s20 = scalar_lea.sflag (%p1302_p5), [#allocation6], %s388_s19 }
  0x44   : > { %401 = vsyncadd %s389_s20, 512  ;;  %s1227_s21 = smov [#allocation7]   ;;  %s1108_s13 = scalar_lea.hbm %s1514_s5, 128 }
  0x45   : > { %s407_s23 = sshll.u32 %s1227_s21, 4  ;;  %p1109_p12 = scmp.ne.s32.totalorder %s1514_s5, %s1108_s13  ;;  %s408_s23 = int_to_ptr.vmem [resolvable:$true] %s407_s23 }
  0x46   : > { %p1114_p13 = scmp.lt.s32.totalorder %s1108_s13, %s1108_s13 }
  0x48   : > { %p1116_p0 = pnand %p1114_p13, %p1109_p12 }
  0x4a   : > { %1119 = shalt.err (!%p1116_p0)
}
  0x4b   : > { %s1120_s22 = scalar_lea.vmem %s408_s23, 128  ;;  %s1126_s24 = scalar_lea.vmem %s408_s23, 1280 }
  0x4c   : > { %p1121_p1 = scmp.ne.s32.totalorder %s408_s23, %s1120_s22  ;;  %p1127_p2 = scmp.lt.s32.totalorder %s408_s23, %s408_s23 }
  0x4d   : > { %p1128_p3 = scmp.lt.s32.totalorder %s1126_s24, %s1120_s22 }
  0x4f   : > { %p1129_p4 = por %p1128_p3, %p1127_p2 }
  0x51   : > { %p1130_p7 = pnand %p1129_p4, %p1121_p1 }
  0x53   : > { %1133 = shalt.err (!%p1130_p7)
}
  0x54   : > { %410 = dma.hbm_to_vmem [thread:$0]  %s1514_s5, 128, %s408_s23, %s389_s20  }
  0x55 PF: > { %413 = sbr.rel (!%p1302_p5) target bundleno = 107 (0x6b), region = 44 }
  0x5a   : > { %427 = vsyncadd [#allocation9], 512  ;;  %s1228_s17 = smov [#allocation8]   ;;  %s1134_s10 = scalar_lea.hbm %s1515_s6, 128 }
  0x5b   : > { %s433_s18 = sshll.u32 %s1228_s17, 4  ;;  %p1135_p8 = scmp.ne.s32.totalorder %s1515_s6, %s1134_s10  ;;  %s434_s18 = int_to_ptr.vmem [resolvable:$true] %s433_s18 }
  0x5c   : > { %p1140_p9 = scmp.lt.s32.totalorder %s1134_s10, %s1134_s10 }
  0x5e   : > { %p1142_p10 = pnand %p1140_p9, %p1135_p8 }
  0x60   : > { %1145 = shalt.err (!%p1142_p10)
}
  0x61   : > { %s1146_s20 = scalar_lea.vmem %s434_s18, 128  ;;  %s1152_s23 = scalar_lea.vmem %s434_s18, 1280 }
  0x62   : > { %p1147_p11 = scmp.ne.s32.totalorder %s434_s18, %s1146_s20  ;;  %p1153_p12 = scmp.lt.s32.totalorder %s434_s18, %s434_s18 }
  0x63   : > { %p1154_p5 = scmp.lt.s32.totalorder %s1152_s23, %s1146_s20 }
  0x65   : > { %p1155_p13 = por %p1154_p5, %p1153_p12 }
  0x67   : > { %p1156_p0 = pnand %p1155_p13, %p1147_p11 }
  0x69   : > { %1159 = shalt.err (!%p1156_p0)
}
  0x6a   : > { %436 = dma.hbm_to_vmem [thread:$0]  %s1515_s6, 128, %s434_s18, [#allocation9]  }
  0x6b PF: > { %p986_p1 = scmp.ge.s32.totalorder %s1223_s28, 1  ;;  %p438_p2 = scmp.lt.s32.totalorder %s1223_s28, 3 }
  0x6d   : > { %p439_p3 = pnand %p986_p1, %p438_p2 }
  0x6e   : > { %s444_s15 = sand.u32 (!%p439_p3), 1, %s1211_s25  }
  0x6f   : > { %442 = sbr.rel (%p439_p3) target bundleno = 366 (0x16e), region = 48  ;;  %s445_s24 = scalar_lea.sflag (!%p439_p3), [#allocation4], %s444_s15 }
  0x70   : > { %s1000_s22 = smul.u32 (!%p439_p3), 40, %s444_s15 }
  0x72   : > { %s1360_s11 = scalar_lea.vmem (!%p439_p3), [#allocation3], %s1000_s22 }
  0x74   : > { %1185 = dma.done.wait (%p1306_p6), %s445_s24, 640  }
  0x75   : > { %1187 = vsyncadd (%p1306_p6), %s445_s24, 4294966656  ;;  %s453_s16 = sand.u32 1, %s962_s30   ;;  %s457_s18 = scalar_lea.vmem [#allocation5], %s1000_s22 }
  0x76   : > { %s454_s17 = scalar_lea.sflag [#allocation6], %s453_s16 }
  0x77   : > { %1189 = dma.done.wait (%p1306_p6), %s454_s17, 1280  }
  0x78   : > { %1191 = vsyncadd (%p1306_p6), %s454_s17, 4294966016  ;;  %s1372_s19 = scalar_lea.vmem [#allocation7], %s1000_s22  ;;  %s472_s21 = scalar_lea.sflag [#allocation9], %s444_s15 }
  0x79   : > { %s1374_s10 = scalar_lea.vmem [#allocation8], %s1000_s22 }
  0x7a   : > { %1193 = dma.done.wait (%p1306_p6), %s472_s21, 640  }
  0x7b   : > { %1195 = vsyncadd (%p1306_p6), %s472_s21, 4294966656  ;;  %p541_p4 = scmp.lt.s32.totalorder %s1215_s26, 0  ;;  %v707_v0 = vlaneseq  ;;  %s738_s13 = smul.u32 640, %s1215_s26  ;;  %v1385_v3 = vld [vmem:[%s457_s18] sm:$0xff]  ;;  %v1387_v7 = vld [vmem:[%s457_s18 + $0x8] sm:$0xff] }
  0x7c   : > { %v1389_v8 = vld [vmem:[%s457_s18 + $0x10] sm:$0xff]  ;;  %v1391_v9 = vld [vmem:[%s457_s18 + $0x18] sm:$0xff]  ;;  %v1393_v12 = vld [vmem:[%s457_s18 + $0x20] sm:$0xff]  ;;  %p596_p6 = scmp.lt.s32.totalorder %s1215_s26, 1 }
  0x7d   : > { %s542_s30 = scalar_select %p541_p4, %s1215_s26, 0  ;;  %v740_v1 = vand.u32 127, %v707_v0  ;;  %v1383_v2 = vshrl.u32 %v707_v0, 7  ;;  %v745_v11 = vstv %s738_s13  ;;  %v629_v13 = vld [vmem:[%s1372_s19] sm:$0xff]  ;;  %v630_v14 = vld [vmem:[%s1372_s19 + $0x8] sm:$0xff]  ;;  %v631_v17 = vld [vmem:[%s1372_s19 + $0x10] sm:$0xff] }
  0x7e   : > { %v632_v18 = vld [vmem:[%s1372_s19 + $0x18] sm:$0xff]  ;;  %v633_v19 = vld [vmem:[%s1372_s19 + $0x20] sm:$0xff]  ;;  %v1430_v34 = vld [vmem:[%s1360_s11 + $0x8] sm:$0xff]  ;;  %s1528_s26 = smov (!%p596_p6, %s1215_s26), 1 }
  0x7f   : > { %s543_s12 = smul.u32 5, %s542_s30  ;;  %v741_v4 = vadd.s32 128, %v740_v1  ;;  %v742_v5 = vadd.s32 256, %v740_v1  ;;  %v743_v6 = vadd.s32 384, %v740_v1  ;;  %v744_v10 = vadd.s32 512, %v740_v1  ;;  %v1427_v33 = vld [vmem:[%s1360_s11] sm:$0xff] }
  0x80   : > { %v709_v15 = vsub.s32 0, %v1383_v2  ;;  %v713_v16 = vsub.s32 1, %v1383_v2  ;;  %v717_v20 = vsub.s32 2, %v1383_v2  ;;  %v721_v21 = vsub.s32 3, %v1383_v2  ;;  %v621_v42 = vld [vmem:[%s1360_s11 + $0x10] sm:$0xff]  ;;  %v622_v48 = vld [vmem:[%s1360_s11 + $0x18] sm:$0xff] }
  0x81   : > { %p546_p7 = scmp.lt.s32.totalorder %s543_s12, 0  ;;  %v1415_v26 = vadd.s32 %v745_v11, %v740_v1  ;;  %v1417_v27 = vadd.s32 %v745_v11, %v741_v4  ;;  %v1419_v28 = vadd.s32 %v745_v11, %v742_v5  ;;  %v1421_v29 = vadd.s32 %v745_v11, %v743_v6  ;;  %v634_v49 = vld [vmem:[%s1374_s10] sm:$0xff]  ;;  %v635_v50 = vld [vmem:[%s1374_s10 + $0x8] sm:$0xff]  ;;  %v623_v55 = vld [vmem:[%s1360_s11 + $0x20] sm:$0xff]  ;;  %s989_s16 = sshll.u32 %s1528_s26, 3 }
  0x82   : > { %v1436_v38 = vadd.s32 %v745_v11, %v744_v10  ;;  %v636_v56 = vld [vmem:[%s1374_s10 + $0x10] sm:$0xff]  ;;  %v637_v57 = vld [vmem:[%s1374_s10 + $0x18] sm:$0xff]  ;;  %v638_v58 = vld [vmem:[%s1374_s10 + $0x20] sm:$0xff]  ;;  %v664_v61 = vsub.f32 %v634_v49, %v1427_v33  ;;  %v665_v62 = vsub.f32 %v635_v50, %v1430_v34  ;;  %s599_s19 = scalar_lea.vmem %s1516_s7, %s989_s16 }
  0x83   : > { %s1526_s12 = smov (!%p546_p7, %s543_s12), 0  ;;  %v666_v4 = vsub.f32 %v636_v56, %v621_v42  ;;  %v667_v11 = vsub.f32 %v637_v57, %v622_v48  ;;  %vm751_vm0 = vcmp.lt.s32.totalorder %v1415_v26, 5  ;;  %vm752_vm1 = vcmp.lt.s32.totalorder %v1417_v27, 5 }
  0x84   : > { %s987_s9 = sshll.u32 %s1526_s12, 3  ;;  %vm753_vm2 = vcmp.lt.s32.totalorder %v1419_v28, 5  ;;  %vm754_vm4 = vcmp.lt.s32.totalorder %v1421_v29, 5  ;;  %vm755_vm10 = vcmp.lt.s32.totalorder %v1436_v38, 5 }
  0x85   : > { %s549_s8 = scalar_lea.vmem %s1510_s1, %s987_s9  ;;  %s1405_s22 = scalar_lea.vmem %s1511_s2, %s987_s9  ;;  %v671_v22 = vand.u32 2147483647, %v666_v4  ;;  %v672_v50 = vand.u32 2147483647, %v667_v11 }
  0x86   : > { %v609_v23 = vld [vmem:[%s549_s8] sm:$0xff]  ;;  %v610_v24 = vld [vmem:[%s549_s8 + $0x8] sm:$0xff]  ;;  %v1413_v25 = vld [vmem:[%s549_s8 + $0x10] sm:$0xff] }
  0x87   : > { %v612_v30 = vld [vmem:[%s549_s8 + $0x18] sm:$0xff]  ;;  %v1423_v31 = vld [vmem:[%s549_s8 + $0x20] sm:$0xff]  ;;  %v639_v35 = vsub.f32 %v1385_v3, %v609_v23  ;;  %v640_v36 = vsub.f32 %v1387_v7, %v610_v24  ;;  %v641_v37 = vsub.f32 %v1389_v8, %v1413_v25  ;;  %v615_v39 = vld [vmem:[%s1405_s22 + $0x8] sm:$0xff] }
  0x88   : > { %v614_v32 = vld [vmem:[%s1405_s22] sm:$0xff]  ;;  %v616_v40 = vld [vmem:[%s1405_s22 + $0x10] sm:$0xff]  ;;  %v617_v41 = vld [vmem:[%s1405_s22 + $0x18] sm:$0xff]  ;;  %v642_v43 = vsub.f32 %v1391_v9, %v612_v30  ;;  %v643_v44 = vsub.f32 %v1393_v12, %v1423_v31  ;;  %v650_v52 = vsub.f32 %v630_v14, %v615_v39 }
  0x89   : > { %v649_v45 = vsub.f32 %v629_v13, %v614_v32  ;;  %v679_v46 = vadd.f32 %v614_v32, %v609_v23  ;;  %v618_v47 = vld [vmem:[%s1405_s22 + $0x20] sm:$0xff]  ;;  %v644_v51 = vand.u32 2147483647, %v639_v35  ;;  %v651_v53 = vsub.f32 %v631_v17, %v616_v40 }
  0x8a   : > { %v652_v54 = vsub.f32 %v632_v18, %v617_v41  ;;  %v645_v59 = vand.u32 2147483647, %v640_v36  ;;  %v653_v60 = vsub.f32 %v633_v19, %v618_v47  ;;  %v646_v63 = vand.u32 2147483647, %v641_v37 }
  0x8b   : > { %v647_v0 = vand.u32 2147483647, %v642_v43  ;;  %v648_v1 = vand.u32 2147483647, %v643_v44  ;;  %v654_v5 = vand.u32 2147483647, %v649_v45  ;;  %v668_v17 = vsub.f32 %v638_v58, %v623_v55 }
  0x8c   : > { %v655_v6 = vand.u32 2147483647, %v650_v52  ;;  %v656_v10 = vand.u32 2147483647, %v651_v53  ;;  %v657_v13 = vand.u32 2147483647, %v652_v54  ;;  %v680_v44 = vadd.f32 %v615_v39, %v610_v24 }
  0x8d   : > { %v658_v14 = vand.u32 2147483647, %v653_v60  ;;  %v669_v18 = vand.u32 2147483647, %v664_v61  ;;  %v659_v23 = vadd.f32 %v654_v5, %v644_v51  ;;  %v670_v19 = vand.u32 2147483647, %v665_v62 }
  0x8e   : > { %v660_v32 = vadd.f32 %v655_v6, %v645_v59  ;;  %v661_v35 = vadd.f32 %v656_v10, %v646_v63  ;;  %v662_v36 = vadd.f32 %v657_v13, %v647_v0  ;;  %v673_v37 = vand.u32 2147483647, %v668_v17  ;;  %v704_v45 = vld [vmem:[%s1509_s0] sm:$0x1f] }
  0x8f   : > { %v663_v49 = vadd.f32 %v658_v14, %v648_v1  ;;  %v674_v43 = vadd.f32 %v669_v18, %v659_v23  ;;  %v681_v51 = vadd.f32 %v616_v40, %v1413_v25  ;;  %v682_v54 = vadd.f32 %v617_v41, %v612_v30 }
  0x90   : > { %v675_v52 = vadd.f32 %v670_v19, %v660_v32  ;;  %v676_v53 = vadd.f32 %v671_v22, %v661_v35  ;;  %v677_v56 = vadd.f32 %v672_v50, %v662_v36  ;;  %v683_v57 = vadd.f32 %v618_v47, %v1423_v31 }
  0x91   : > { %v684_v24 = vadd.f32 %v679_v46, %v1427_v33  ;;  %v685_v39 = vadd.f32 %v680_v44, %v1430_v34  ;;  %v678_v58 = vadd.f32 %v673_v37, %v663_v49  ;;  %v686_v59 = vadd.f32 %v681_v51, %v621_v42 }
  0x92   : > { %v687_v60 = vadd.f32 %v682_v54, %v622_v48  ;;  %vm705_vm3 = vcmp.gt.f32.partialorder %v704_v45, 0.5  ;;  %v688_v22 = vadd.f32 %v683_v57, %v623_v55  ;;  %v1229_v40 = vmov 0  }
  0x93   : > { %v689_v25 = vmul.f32 0.33333334, %v684_v24  ;;  %v690_v30 = vmul.f32 0.33333334, %v685_v39  ;;  %v706_v41 = vsel %vm705_vm3, 1, %v1229_v40 }
  0x94   : > { %v691_v61 = vmul.f32 0.33333334, %v686_v59  ;;  %v692_v62 = vmul.f32 0.33333334, %v687_v60  ;;  %v710_v31 = vrot.slane %v706_v41, %v709_v15  ;;  %v714_v33 = vrot.slane %v706_v41, %v713_v16 }
  0x95   : > { %v693_v34 = vmul.f32 0.33333334, %v688_v22  ;;  %v694_v42 = vsub.f32 %v1385_v3, %v689_v25  ;;  %v695_v46 = vsub.f32 %v1387_v7, %v690_v30  ;;  %v718_v47 = vrot.slane %v706_v41, %v717_v20 }
  0x96   : > { %v696_v48 = vsub.f32 %v1389_v8, %v691_v61  ;;  %v697_v55 = vsub.f32 %v1391_v9, %v692_v62  ;;  %v722_v63 = vrot.slane %v706_v41, %v721_v21  ;;  %v1519_v15 = vsub.s32 4, %v1383_v2 }
  0x97   : > { %v698_v16 = vsub.f32 %v1393_v12, %v693_v34  ;;  %v699_v1 = vand.u32 2147483647, %v694_v42  ;;  %v700_v4 = vand.u32 2147483647, %v695_v46  ;;  %vm727_vm5 = vcmp.eq.s32.totalorder %v710_v31, 1 }
  0x98   : > { %v726_v0 = vrot.slane %v706_v41, %v1519_v15  ;;  %v701_v3 = vand.u32 2147483647, %v696_v48  ;;  %v702_v7 = vand.u32 2147483647, %v697_v55  ;;  %vm728_vm6 = vcmp.eq.s32.totalorder %v714_v33, 1 }
  0x99   : > { %vm729_vm7 = vcmp.eq.s32.totalorder %v718_v47, 1  ;;  %v703_v20 = vand.u32 2147483647, %v698_v16  ;;  %vm730_vm8 = vcmp.eq.s32.totalorder %v722_v63, 1  ;;  %v732_v8 = vsel %vm727_vm5, %v674_v43, %v699_v1 }
  0x9a   : > { %vm731_vm9 = vcmp.eq.s32.totalorder %v726_v0, 1  ;;  %v733_v9 = vsel %vm728_vm6, %v675_v52, %v700_v4  ;;  %v734_v5 = vsel %vm729_vm7, %v676_v53, %v701_v3  ;;  %v735_v6 = vsel %vm730_vm8, %v677_v56, %v702_v7 }
  0x9b   : > { %v756_v2 = vsel %vm751_vm0, %v732_v8, 0.0  ;;  %v757_v12 = vsel %vm752_vm1, %v733_v9, 0.0  ;;  %v758_v21 = vsel %vm753_vm2, %v734_v5, 0.0  ;;  %v736_v10 = vsel %vm731_vm9, %v678_v58, %v703_v20 }
  0x9c   : > { %v784_v11 = vadd.f32 %v757_v12, %v756_v2  ;;  %v759_v13 = vsel %vm754_vm4, %v735_v6, 0.0  ;;  %v760_v17 = vsel %vm755_vm10, %v736_v10, 0.0 }
  0x9e   : > { %v785_v14 = vadd.f32 %v784_v11, %v758_v21 }
  0xa0   : > { %v786_v18 = vadd.f32 %v785_v14, %v759_v13 }
  0xa2   : > { %v787_v26 = vadd.f32 %v786_v18, %v760_v17 }
  0xa4   : > { %788 = vadd.xlane.f32.xlu0 %v787_v26 }
 0x12d   : > { %v789_v23 = vpop.xlane.xlu0 %788 }
 0x12e   : > { %v790_v27 = vrot.slane %v789_v23, 4 }
 0x130   : > { %v791_v32 = vadd.f32 %v790_v27, %v789_v23 }
 0x132   : > { %v792_v35 = vrot.slane %v791_v32, 2 }
 0x134   : > { %v793_v28 = vadd.f32 %v792_v35, %v791_v32 }
 0x136   : > { %v794_v19 = vrot.slane %v793_v28, 1 }
 0x138   : > { %v795_v36 = vadd.f32 %v794_v19, %v793_v28 }
 0x13a   : > { %1001 = vpush %v795_v36 }
 0x16b   : > { %s1002_s21 = spop %1001 }
 0x16c   : > { %v797_v29 = vstv %s1002_s21 }
 0x16d   : > { %798 = vst [vmem:[%s599_s19] sm:$0xff] %v797_v29 }
 0x16e PF: > { %s26_s28 = sadd.s32 1, %s1223_s28   ;;  %s1520_s24 = smov %s1211_s25 }
 0x16f   : > { %p23_p8 = scmp.ge.s32.totalorder %s26_s28, 4   ;;  %s1499_s25 = smov 0  }
 0x170   : > { %s1521_s26 = smov %s1219_s27  ;;  %s1522_s27 = smov %s1524_s29 }
 0x171   :  { %25 = sbr.rel (!%p23_p8) target bundleno = 8 (0x8), region = 139 }
 0x176   :  { %818 = vsyncpa [#allocation4], 1 }
 0x177   :  { %820 = vsyncpa [#allocation4 + $0x1], 1 }
 0x178   :  { %821 = vsyncpa [#allocation6], 1 }
 0x179   :  { %823 = vsyncpa [#allocation6 + $0x1], 1 }
 0x17a   :  { %824 = vsyncpa [#allocation9], 1 }
 0x17b   :  { %826 = vsyncpa [#allocation9 + $0x1], 1 }

</bundles_post_ra>
